<compile_context>
chip_gen: v6e
topology: v6e:2x2x1
jax: 0.10.0
libtpu: 0.0.40
codegen_flags: <defaults>
</compile_context>

<pallas_src>
import functools

import jax
import jax.numpy as jnp
from jax import lax
from jax.experimental import pallas as pl
from jax.experimental.pallas import tpu as pltpu


def _normalize_kernel(x_ref, o_ref, *, power, channels):
    # x_ref / o_ref: (1, C, TS, TL) blocks in VMEM.  (TS, TL) is the packed
    # sublane x lane plane of spatial positions.
    def load_ch(k):
        return x_ref[0, k].astype(jnp.float32)  # (TS, TL) plane

    if channels <= 32:
        # Unrolled per-channel accumulation: C-1 VPU adds on fully packed
        # vregs; only one channel plane is live at a time.
        s = None
        for k in range(channels):
            xk = load_ch(k)
            if power == 2:
                xp = xk * xk
            elif isinstance(power, int):
                xp = lax.integer_pow(xk, power)  # stays on the VALUs
            else:
                xp = jnp.power(xk, power)        # literal torch .pow semantics
            s = xp if s is None else s + xp
    else:
        # Large channel counts: materialize once and let the compiler emit a
        # packed channel-axis reduction instead of a long serial add chain.
        x_all = x_ref[0].astype(jnp.float32)     # (C, TS, TL)
        if power == 2:
            s = jnp.sum(x_all * x_all, axis=0)
        elif isinstance(power, int):
            s = jnp.sum(lax.integer_pow(x_all, power), axis=0)
        else:
            s = jnp.sum(jnp.power(x_all, power), axis=0)

    # TODO(synk): PyTorch's literal expression has no eps, so an all-zero
    # channel vector yields inf/nan here too (intentional parity).
    if power == 2:
        inv = lax.rsqrt(s)                       # EUP slot: essentially free
    else:
        inv = jnp.power(s, -1.0 / power)         # single pow, no extra divide

    if channels <= 32:
        for k in range(channels):
            o_ref[0, k] = (load_ch(k) * inv).astype(o_ref.dtype)
    else:
        o_ref[0] = (x_all * inv[None]).astype(o_ref.dtype)


def normalize(x, power=2, block_bytes=4 * 1024 * 1024):
    """L_p-normalize over the channel dim (dim=1) of an NCHW tensor, matching
    the PyTorch `Normalize` module's forward."""
    n, c, h, w = x.shape
    hw = h * w
    itemsize = jnp.dtype(x.dtype).itemsize

    if hw % 128 == 0:
        # Packed layout: spatial occupies sublanes AND lanes (free view of
        # contiguous NCHW).  Tiles and intermediates are fully packed.
        S, L = hw // 128, 128
        tile_l = L
        tile_s = max(8, (block_bytes // (c * L * itemsize)) // 8 * 8)
        if tile_s >= S:
            tile_s = S  # full sublane extent is always a legal block dim
        # Keep >= 2 grid blocks when possible so both v7x TensorCores work.
        if n * pl.cdiv(S, tile_s) < 2 and S >= 16:
            tile_s = max(8, (S // 2) // 8 * 8)
    else:
        # Fallback: spatial only on lanes; blocking stays a multiple of 128 so
        # only the single tail block has masked stores.
        S, L = 1, hw
        tile_s = 1
        if hw < 128:
            tile_l = hw  # full lane extent (tiny tensor)
        else:
            tile_l = max(128, (block_bytes // (c * itemsize)) // 128 * 128)
            tile_l = min(tile_l, (hw // 128) * 128)

    x4 = x.reshape(n, c, S, L)
    grid = (n, pl.cdiv(S, tile_s), pl.cdiv(L, tile_l))

    out4 = pl.pallas_call(
        functools.partial(_normalize_kernel, power=power, channels=c),
        out_shape=jax.ShapeDtypeStruct((n, c, S, L), x.dtype),
        grid_spec=pltpu.PrefetchScalarGridSpec(
            num_scalar_prefetch=0,
            grid=grid,
            in_specs=[pl.BlockSpec((1, c, tile_s, tile_l),
                                   lambda i, j, k: (i, 0, j, k))],
            out_specs=pl.BlockSpec((1, c, tile_s, tile_l),
                                   lambda i, j, k: (i, 0, j, k)),
        ),
        compiler_params=pltpu.CompilerParams(
            dimension_semantics=("parallel", "parallel", "parallel"),
            vmem_limit_bytes=48 * 1024 * 1024),
    )(x4)

    return out4.reshape(n, c, h, w)


if __name__ == "__main__":
    key = jax.random.PRNGKey(0)
    # Small NCHW input consistent with typical conv feature maps.
    x = jax.random.normal(key, (2, 4, 16, 16), dtype=jnp.float32)

    out = normalize(x, power=2)
    out = jax.block_until_ready(out)

    # Reference (pure JAX, mirrors the PyTorch forward exactly).
    ref = x / jnp.power(jnp.sum(jnp.power(x, 2), axis=1, keepdims=True), 0.5)
    assert out.shape == x.shape and out.dtype == x.dtype
    assert jnp.allclose(out, ref, atol=1e-5, rtol=1e-5)

    print("KERNEL_OK")
</pallas_src>

<mosaic_0001>
module attributes {stable_mosaic.version = 11 : i64} {
  func.func @_normalize_kernel(%arg0: i32, %arg1: i32, %arg2: i32, %arg3: memref<1x4x2x128xf32, #tpu.memory_space<vmem>>, %arg4: memref<1x4x2x128xf32, #tpu.memory_space<vmem>>) attributes {dimension_semantics = [#tpu.dimension_semantics<parallel>, #tpu.dimension_semantics<parallel>, #tpu.dimension_semantics<parallel>], iteration_bounds = array<i64: 2, 1, 1>, scalar_prefetch = 0 : i64, scratch_operands = 0 : i64, tpu.core_type = #tpu.core_type<tc>, window_params = [{transform_indices = @transform_0, window_bounds = array<i64: 1, 4, 2, 128>}, {transform_indices = @transform_1, window_bounds = array<i64: 1, 4, 2, 128>}]} {
    %c0 = arith.constant 0 : index
    %c0_0 = arith.constant 0 : index
    %c0_1 = arith.constant 0 : index
    %c0_2 = arith.constant 0 : index
    %0 = vector.load %arg3[%c0, %c0_0, %c0_1, %c0_2] : memref<1x4x2x128xf32, #tpu.memory_space<vmem>>, vector<1x1x2x128xf32>
    %1 = vector.shape_cast %0 : vector<1x1x2x128xf32> to vector<2x128xf32>
    %2 = arith.mulf %1, %1 : vector<2x128xf32>
    %c0_3 = arith.constant 0 : index
    %c1 = arith.constant 1 : index
    %c0_4 = arith.constant 0 : index
    %c0_5 = arith.constant 0 : index
    %3 = vector.load %arg3[%c0_3, %c1, %c0_4, %c0_5] : memref<1x4x2x128xf32, #tpu.memory_space<vmem>>, vector<1x1x2x128xf32>
    %4 = vector.shape_cast %3 : vector<1x1x2x128xf32> to vector<2x128xf32>
    %5 = arith.mulf %4, %4 : vector<2x128xf32>
    %6 = arith.addf %2, %5 : vector<2x128xf32>
    %c0_6 = arith.constant 0 : index
    %c2 = arith.constant 2 : index
    %c0_7 = arith.constant 0 : index
    %c0_8 = arith.constant 0 : index
    %7 = vector.load %arg3[%c0_6, %c2, %c0_7, %c0_8] : memref<1x4x2x128xf32, #tpu.memory_space<vmem>>, vector<1x1x2x128xf32>
    %8 = vector.shape_cast %7 : vector<1x1x2x128xf32> to vector<2x128xf32>
    %9 = arith.mulf %8, %8 : vector<2x128xf32>
    %10 = arith.addf %6, %9 : vector<2x128xf32>
    %c0_9 = arith.constant 0 : index
    %c3 = arith.constant 3 : index
    %c0_10 = arith.constant 0 : index
    %c0_11 = arith.constant 0 : index
    %11 = vector.load %arg3[%c0_9, %c3, %c0_10, %c0_11] : memref<1x4x2x128xf32, #tpu.memory_space<vmem>>, vector<1x1x2x128xf32>
    %12 = vector.shape_cast %11 : vector<1x1x2x128xf32> to vector<2x128xf32>
    %13 = arith.mulf %12, %12 : vector<2x128xf32>
    %14 = arith.addf %10, %13 : vector<2x128xf32>
    %15 = math.rsqrt %14 : vector<2x128xf32>
    %c0_12 = arith.constant 0 : index
    %c0_13 = arith.constant 0 : index
    %c0_14 = arith.constant 0 : index
    %c0_15 = arith.constant 0 : index
    %16 = vector.load %arg3[%c0_12, %c0_13, %c0_14, %c0_15] : memref<1x4x2x128xf32, #tpu.memory_space<vmem>>, vector<1x1x2x128xf32>
    %17 = vector.shape_cast %16 : vector<1x1x2x128xf32> to vector<2x128xf32>
    %18 = arith.mulf %17, %15 : vector<2x128xf32>
    %c0_16 = arith.constant 0 : index
    %c0_17 = arith.constant 0 : index
    %c0_18 = arith.constant 0 : index
    %c0_19 = arith.constant 0 : index
    %19 = vector.load %arg4[%c0_16, %c0_17, %c0_18, %c0_19] : memref<1x4x2x128xf32, #tpu.memory_space<vmem>>, vector<1x1x2x128xf32>
    %20 = vector.shape_cast %19 : vector<1x1x2x128xf32> to vector<2x128xf32>
    %21 = vector.shape_cast %18 : vector<2x128xf32> to vector<1x1x2x128xf32>
    tpu.vector_store %arg4[%c0_16, %c0_17, %c0_18, %c0_19], %21 {strides = array<i32>} : memref<1x4x2x128xf32, #tpu.memory_space<vmem>>, vector<1x1x2x128xf32>,
    %c0_20 = arith.constant 0 : index
    %c1_21 = arith.constant 1 : index
    %c0_22 = arith.constant 0 : index
    %c0_23 = arith.constant 0 : index
    %22 = vector.load %arg3[%c0_20, %c1_21, %c0_22, %c0_23] : memref<1x4x2x128xf32, #tpu.memory_space<vmem>>, vector<1x1x2x128xf32>
    %23 = vector.shape_cast %22 : vector<1x1x2x128xf32> to vector<2x128xf32>
    %24 = arith.mulf %23, %15 : vector<2x128xf32>
    %c0_24 = arith.constant 0 : index
    %c1_25 = arith.constant 1 : index
    %c0_26 = arith.constant 0 : index
    %c0_27 = arith.constant 0 : index
    %25 = vector.load %arg4[%c0_24, %c1_25, %c0_26, %c0_27] : memref<1x4x2x128xf32, #tpu.memory_space<vmem>>, vector<1x1x2x128xf32>
    %26 = vector.shape_cast %25 : vector<1x1x2x128xf32> to vector<2x128xf32>
    %27 = vector.shape_cast %24 : vector<2x128xf32> to vector<1x1x2x128xf32>
    tpu.vector_store %arg4[%c0_24, %c1_25, %c0_26, %c0_27], %27 {strides = array<i32>} : memref<1x4x2x128xf32, #tpu.memory_space<vmem>>, vector<1x1x2x128xf32>,
    %c0_28 = arith.constant 0 : index
    %c2_29 = arith.constant 2 : index
    %c0_30 = arith.constant 0 : index
    %c0_31 = arith.constant 0 : index
    %28 = vector.load %arg3[%c0_28, %c2_29, %c0_30, %c0_31] : memref<1x4x2x128xf32, #tpu.memory_space<vmem>>, vector<1x1x2x128xf32>
    %29 = vector.shape_cast %28 : vector<1x1x2x128xf32> to vector<2x128xf32>
    %30 = arith.mulf %29, %15 : vector<2x128xf32>
    %c0_32 = arith.constant 0 : index
    %c2_33 = arith.constant 2 : index
    %c0_34 = arith.constant 0 : index
    %c0_35 = arith.constant 0 : index
    %31 = vector.load %arg4[%c0_32, %c2_33, %c0_34, %c0_35] : memref<1x4x2x128xf32, #tpu.memory_space<vmem>>, vector<1x1x2x128xf32>
    %32 = vector.shape_cast %31 : vector<1x1x2x128xf32> to vector<2x128xf32>
    %33 = vector.shape_cast %30 : vector<2x128xf32> to vector<1x1x2x128xf32>
    tpu.vector_store %arg4[%c0_32, %c2_33, %c0_34, %c0_35], %33 {strides = array<i32>} : memref<1x4x2x128xf32, #tpu.memory_space<vmem>>, vector<1x1x2x128xf32>,
    %c0_36 = arith.constant 0 : index
    %c3_37 = arith.constant 3 : index
    %c0_38 = arith.constant 0 : index
    %c0_39 = arith.constant 0 : index
    %34 = vector.load %arg3[%c0_36, %c3_37, %c0_38, %c0_39] : memref<1x4x2x128xf32, #tpu.memory_space<vmem>>, vector<1x1x2x128xf32>
    %35 = vector.shape_cast %34 : vector<1x1x2x128xf32> to vector<2x128xf32>
    %36 = arith.mulf %35, %15 : vector<2x128xf32>
    %c0_40 = arith.constant 0 : index
    %c3_41 = arith.constant 3 : index
    %c0_42 = arith.constant 0 : index
    %c0_43 = arith.constant 0 : index
    %37 = vector.load %arg4[%c0_40, %c3_41, %c0_42, %c0_43] : memref<1x4x2x128xf32, #tpu.memory_space<vmem>>, vector<1x1x2x128xf32>
    %38 = vector.shape_cast %37 : vector<1x1x2x128xf32> to vector<2x128xf32>
    %39 = vector.shape_cast %36 : vector<2x128xf32> to vector<1x1x2x128xf32>
    tpu.vector_store %arg4[%c0_40, %c3_41, %c0_42, %c0_43], %39 {strides = array<i32>} : memref<1x4x2x128xf32, #tpu.memory_space<vmem>>, vector<1x1x2x128xf32>,
    return
  }
  func.func @transform_0(%arg0: i32, %arg1: i32, %arg2: i32) -> (i32, i32, i32, i32) {
    %c0_i32 = arith.constant 0 : i32
    %c0_i32_0 = arith.constant 0 : i32
    return %arg0, %c0_i32, %arg1, %arg2 : i32, i32, i32, i32
  }
  func.func @transform_1(%arg0: i32, %arg1: i32, %arg2: i32) -> (i32, i32, i32, i32) {
    %c0_i32 = arith.constant 0 : i32
    %c0_i32_0 = arith.constant 0 : i32
    return %arg0, %c0_i32, %arg1, %arg2 : i32, i32, i32, i32
  }
}

</mosaic_0001>

<bundles_post_ra>
// kernel: tpu_custom_call.1
= control target key start
LH: loop header
LB: loop body
LE: loop exit
PB: predicated region body
PF: predicated region fallthrough
CT: control target
= control target key end

     0   :  { %6 = vsyncpa [#allocation3], 0  ;;  %s665_s0 = inlined_call_operand.hbm [shape: f32[2,4,2,128], index: 0, kind: input, shape index: {}]   ;;  %s666_s1 = inlined_call_operand.hbm [shape: f32[2,4,2,128], index: 1, kind: output, shape index: {}]  }
   0x1   :  { %8 = vsyncpa [#allocation3 + $0x1], 0 }
   0x2   :  { %9 = vsyncpa [#allocation4], 0 }
   0x3   :  { %11 = vsyncpa [#allocation4 + $0x1], 0  ;;  %s519_s6 = smov 0   ;;  %s521_s7 = smov 0  }
   0x4   :  { %s523_s8 = smov 0   ;;  %s525_s9 = smov 0  }
   0x5   :  { %s527_s10 = smov 0   ;;  %s529_s11 = smov 0  }
   0x6 LB: > { %s299_s12 = sadd.s32 4294967295, %s501_s11   ;;  %s300_s13 = sadd.s32 4294967294, %s501_s11   ;;  %s501_s11 = sphi %s529_s11, %s17_s11   ;;  %s497_s10 = sphi %s527_s10, %s677_s10   ;;  %s493_s9 = sphi %s525_s9, %s676_s9   ;;  %s489_s8 = sphi %s523_s8, %s675_s8   ;;  %s485_s7 = sphi %s521_s7, %s674_s7   ;;  %s481_s6 = sphi %s519_s6, %s673_s6  }
   0x7   : > { %s36_s14 = sadd.s32 1, %s497_s10  ;;  %s47_s15 = sadd.s32 1, %s489_s8 }
   0x8   : > { %p38_p0 = scmp.ge.s32.totalorder %s36_s14, 2  ;;  %p54_p1 = scmp.ne.s32.totalorder %s489_s8, %s485_s7 }
   0x9   : > { %p55_p2 = scmp.eq.s32.totalorder %s501_s11, 0  ;;  %p60_p3 = scmp.ne.s32.totalorder %s485_s7, %s481_s6 }
   0xa   : > { %s679_s14 = smov (%p38_p0, %s36_s14), 0  ;;  %p61_p5 = scmp.eq.s32.totalorder %s299_s12, 0 }
   0xb   : > { %p560_p4 = por %p55_p2, %p54_p1  ;;  %s40_s17 = ssub.s32 %s497_s10, %s679_s14 }
   0xc   : > { %p88_p6 = scmp.eq.s32.totalorder %s299_s12, 1  ;;  %p45_p7 = scmp.eq.s32.totalorder %s40_s17, 0 }
   0xd   : > { %p566_p8 = por %p61_p5, %p60_p3  ;;  %p94_p10 = scmp.eq.s32.totalorder %s300_s13, 1 }
   0xe   : > { %p570_p9 = por %p88_p6, %p54_p1  ;;  %p337_p13 = scmp.lt.s32.totalorder %s501_s11, 2 }
   0xf   : > { %s575_s20 = scalar_select %p45_p7, %s489_s8, %s47_s15  }
  0x10   : > { %p577_p11 = por %p94_p10, %p60_p3  ;;  %s114_s22 = sand.u32 1, %s489_s8  }
  0x11   : > { %s303_s23 = sshll.u32 %s114_s22, 3  ;;  %s323_s24 = sshll.u32 %s497_s10, 7 }
  0x12   : > { %s126_s27 = scalar_lea.hbm %s665_s0, %s323_s24  ;;  %s118_s28 = scalar_lea.vmem [#allocation2], %s303_s23 }
  0x13   : > { %s127_s29 = sshll.u32 %s118_s28, 4  ;;  %p590_p0 = pnand %p337_p13, %p560_p4  ;;  %s128_s29 = int_to_ptr.vmem [resolvable:$true] %s127_s29 }
  0x14   : > { %p306_p1 = scmp.ge.s32.totalorder %s501_s11, 1  ;;  %s115_s2 = scalar_lea.sflag [#allocation3], %s114_s22 }
  0x15   : > { %p395_p2 = pneg %p590_p0  ;;  %s406_s3 = scalar_lea.vmem %s128_s29, 128 }
  0x16   : > { %p407_p3 = scmp.ne.s32.totalorder %s128_s29, %s406_s3  ;;  %s503_s4 = smov [#allocation2]  }
  0x17   : > { %s411_s5 = sshll.u32 %s503_s4, 4  ;;  %s412_s5 = int_to_ptr.vmem [resolvable:$false] %s411_s5 }
  0x18   : > { %p409_p5 = pnand %p407_p3, %p395_p2  ;;  %s413_s12 = scalar_lea.vmem %s412_s5, 256 }
  0x19   : > { %p414_p7 = scmp.lt.s32.totalorder %s128_s29, %s412_s5  ;;  %p415_p10 = scmp.lt.s32.totalorder %s413_s12, %s406_s3 }
  0x1a   : > { %p410_p6 = pneg %p409_p5 }
  0x1b   : > { %p416_p12 = por %p415_p10, %p414_p7 }
  0x1d   : > { %p417_p4 = pnand %p416_p12, %p410_p6 }
  0x1f   : > { %420 = shalt.err (!%p417_p4)
}
  0x20   : > { %s504_s13 = smov 32   ;;  %s505_s15 = smov 2  }
  0x21   : > { %332 = dma.hbm_to_vmem [thread:$0]  (!%p590_p0), %s126_s27, 128, %s128_s29, %s115_s2, %s504_s13, %s504_s13, %s505_s15  }
  0x22   : > { %p135_p13 = scmp.lt.s32.totalorder %s501_s11, 3 }
  0x24   : > { %p136_p2 = pnand %p306_p1, %p135_p13 }
  0x25   : > { %s603_s16 = sand.u32 (!%p136_p2), 1, %s485_s7  }
  0x26   : > { %139 = sbr.rel (%p136_p2) target bundleno = 84 (0x54), region = 24  ;;  %s307_s17 = sshll.u32 (!%p136_p2), %s603_s16, 3 }
  0x27   : > { %s142_s22 = scalar_lea.sflag (!%p136_p2), [#allocation3], %s603_s16  ;;  %s145_s23 = scalar_lea.vmem (!%p136_p2), [#allocation2], %s307_s17 }
  0x2b   : > { %472 = dma.done.wait (%p566_p8), %s142_s22, 128  }
  0x2c   : > { %474 = vsyncadd (%p566_p8), %s142_s22, 4294967168  ;;  %v164_v0 = vld [vmem:[%s145_s23] sm:$0x3]  ;;  %v309_v1 = vld [vmem:[%s145_s23 + $0x2] sm:$0x3]  ;;  %s163_s24 = scalar_lea.vmem [#allocation5], %s307_s17 }
  0x2d   : > { %v310_v2 = vld [vmem:[%s145_s23 + $0x4] sm:$0x3]  ;;  %v165_v3 = vmul.f32 %v164_v0, %v164_v0  ;;  %v168_v4 = vmul.f32 %v309_v1, %v309_v1  ;;  %v311_v6 = vld [vmem:[%s145_s23 + $0x6] sm:$0x3]  ;;  %s209_s25 = sshll.u32 %s163_s24, 4  ;;  %s324_s26 = sshll.u32 %s493_s9, 7  ;;  %s612_s25 = int_to_ptr.vmem [resolvable:$true] %s209_s25 }
  0x2e   : > { %v172_v5 = vmul.f32 %v310_v2, %v310_v2  ;;  %v176_v8 = vmul.f32 %v311_v6, %v311_v6  ;;  %v312_v11 = vld [vmem:[%s145_s23 + $0x2] sm:$0x3]  ;;  %v314_v12 = vld [vmem:[%s145_s23 + $0x4] sm:$0x3]  ;;  %v316_v13 = vld [vmem:[%s145_s23 + $0x6] sm:$0x3]  ;;  %s617_s28 = scalar_lea.hbm %s666_s1, %s324_s26 }
  0x2f   : > { %v169_v7 = vadd.f32 %v168_v4, %v165_v3  ;;  %s194_s9 = scalar_lea.sflag [#allocation4], %s603_s16  ;;  %s421_s29 = scalar_lea.vmem %s612_s25, 128 }
  0x30   : > { %p422_p8 = scmp.ne.s32.totalorder %s612_s25, %s421_s29  ;;  %s506_s30 = smov [#allocation5]  }
  0x31   : > { %v173_v9 = vadd.f32 %v172_v5, %v169_v7  ;;  %s425_s2 = sshll.u32 %s506_s30, 4  ;;  %s426_s2 = int_to_ptr.vmem [resolvable:$false] %s425_s2 }
  0x32   : > { %p423_p12 = pnand %p422_p8, %p570_p9  ;;  %s427_s3 = scalar_lea.vmem %s426_s2, 256 }
  0x33   : > { %v177_v10 = vadd.f32 %v176_v8, %v173_v9  ;;  %p428_p1 = scmp.lt.s32.totalorder %s612_s25, %s426_s2  ;;  %p429_p3 = scmp.lt.s32.totalorder %s427_s3, %s421_s29 }
  0x34   : > { %p424_p0 = pneg %p423_p12 }
  0x35   : > { %391 = vrsqrt.f32 %v177_v10  ;;  %p430_p5 = por %p429_p3, %p428_p1 }
  0x37   : > { %p431_p6 = pnand %p430_p5, %p424_p0 }
  0x42   : > { %v392_v14 = vpop.eup %391 }
  0x43   : > { %v179_v15 = vmul.f32 %v392_v14, %v164_v0  ;;  %v182_v16 = vmul.f32 %v392_v14, %v312_v11  ;;  %v186_v17 = vmul.f32 %v392_v14, %v314_v12  ;;  %v190_v18 = vmul.f32 %v392_v14, %v316_v13 }
  0x45   : > { %180 = vst [vmem:[%s163_s24] sm:$0x3] %v179_v15  ;;  %313 = vst [vmem:[%s163_s24 + $0x2] sm:$0x3] %v182_v16 }
  0x46   : > { %315 = vst [vmem:[%s163_s24 + $0x4] sm:$0x3] %v186_v17  ;;  %317 = vst [vmem:[%s163_s24 + $0x6] sm:$0x3] %v190_v18 }
  0x47   : > { %434 = shalt.err (!%p431_p6)
}
  0x48   : > { %s435_s4 = scalar_lea.hbm %s617_s28, 128  ;;  %s439_s13 = scalar_lea.hbm %s666_s1, 256 }
  0x49   : > { %p436_p7 = scmp.ne.s32.totalorder %s617_s28, %s435_s4  ;;  %p440_p13 = scmp.lt.s32.totalorder %s617_s28, %s666_s1 }
  0x4a   : > { %p441_p2 = scmp.lt.s32.totalorder %s439_s13, %s435_s4 }
  0x4b   : > { %p437_p10 = pnand %p436_p7, %p570_p9 }
  0x4c   : > { %p442_p8 = por %p441_p2, %p440_p13 }
  0x4d   : > { %p438_p4 = pneg %p437_p10 }
  0x4f   : > { %p443_p12 = pnand %p442_p8, %p438_p4 }
  0x51   : > { %446 = shalt.err (!%p443_p12)
}
  0x52   : > { %s507_s22 = smov 32   ;;  %s508_s23 = smov 2  }
  0x53   : > { %327 = dma.vmem_to_hbm [thread:$0]  (%p570_p9), %s612_s25, 128, %s617_s28, %s194_s9, %s507_s22, %s507_s22, %s508_s23  }
  0x54 PF: > { %s224_s24 = sand.u32 1, %s481_s6   ;;  %p672_p0 = scmp.ge.s32.totalorder %s501_s11, 2 }
  0x55   : > { %s225_s26 = scalar_lea.sflag [#allocation4], %s224_s24 }
  0x56   : > { %p334_p1 = pnand %p672_p0, %p577_p11 }
  0x58   : > { %p335_p3 = pneg %p334_p1 }
  0x5a   : > { %476 = dma.done.wait (%p335_p3), %s225_s26, 128  }
  0x5b   : > { %478 = vsyncadd (%p335_p3), %s225_s26, 4294967168  ;;  %s17_s11 = sadd.s32 1, %s501_s11   ;;  %s673_s6 = smov %s485_s7 }
  0x5c   : > { %p14_p5 = scmp.ge.s32.totalorder %s17_s11, 4   ;;  %s674_s7 = smov %s489_s8 }
  0x5d   : > { %s675_s8 = smov %s575_s20  ;;  %s676_s9 = smov %s497_s10 }
  0x5e   : > { %s677_s10 = smov %s679_s14  ;;  %16 = sbr.rel (!%p14_p5) target bundleno = 6 (0x6), region = 75 }
  0x63   :  { %230 = vsyncpa [#allocation3], 1 }
  0x64   :  { %232 = vsyncpa [#allocation3 + $0x1], 1 }
  0x65   :  { %233 = vsyncpa [#allocation4], 1 }
  0x66   :  { %235 = vsyncpa [#allocation4 + $0x1], 1 }

</bundles_post_ra>
